<compile_context>
chip_gen: v7x
topology: tpu7x:2x2x1
jax: 0.10.0
libtpu: 0.0.40
codegen_flags: <defaults>
</compile_context>

<pallas_src>
import functools

import jax
import jax.numpy as jnp
from jax.experimental import pallas as pl
from jax.experimental.pallas import tpu as pltpu

_LANE = 128
_SUBLANE = 8


def _round_up(n, m):
    return ((n + m - 1) // m) * m


# ---------------------------------------------------------------------------
# Kernel
# ---------------------------------------------------------------------------
def combined_projection_head_kernel(x_ref, wa_ref, ba_ref, w2_ref, b2_ref, o_ref):
    """One (TM, Dp) batch tile; weights are resident bf16 blocks.

    x_ref : (TM, Dp)   bf16
    wa_ref: (Dp, 2Dp)  bf16   [W1 | W1@Ws]
    ba_ref: (1, 2Dp)   f32    [b1 | b1@Ws + bs]
    w2_ref: (Dp, Dp)   bf16   control_weight folded into rows
    b2_ref: (1, Dp)    f32
    """
    Dp = w2_ref.shape[0]
    x = x_ref[...]                                              # bf16

    # Fused fc1 + selective_fc: one MXU pass with N = 2*Dp, f32 accumulation.
    hs = jnp.dot(x, wa_ref[...], preferred_element_type=jnp.float32) + ba_ref[...]
    h = hs[:, :Dp]
    s = hs[:, Dp:]

    # SiLU gate in f32.
    selective = (s * jax.nn.sigmoid(s)) * h

    # fc2 (control_weight already folded into w2 rows at pack time).
    out = jnp.dot(selective.astype(jnp.bfloat16), w2_ref[...],
                  preferred_element_type=jnp.float32) + b2_ref[...]
    o_ref[...] = out.astype(o_ref.dtype)


# ---------------------------------------------------------------------------
# Capability / capacity queries (each done once, cached)
# ---------------------------------------------------------------------------
@functools.lru_cache(maxsize=None)
def _vmem_budget():
    """Usable VMEM budget with headroom for compiler-internal scratch."""
    cap = 64 << 20                              # conservative default (v7x physical)
    try:
        cap = int(pltpu.get_tpu_info().vmem_capacity_bytes)
    except Exception:
        pass
    return max(min(int(cap * 0.85), cap - (12 << 20)), 16 << 20)


@functools.lru_cache(maxsize=None)
def _supports_buffered_pipeline():
    """One-time probe: does this build accept pipeline_mode=pl.Buffered(1) on
    pallas_call input BlockSpecs?  Compiled on a tiny standalone kernel so a
    failure here can never mask an error in the real kernel."""
    if not hasattr(pl, "Buffered"):
        return False

    def _probe_kernel(c_ref, o_ref):
        o_ref[...] = c_ref[...] + 1.0

    try:
        f = pl.pallas_call(
            _probe_kernel,
            out_shape=jax.ShapeDtypeStruct((16, 128), jnp.float32),
            grid_spec=pltpu.PrefetchScalarGridSpec(
                num_scalar_prefetch=0,
                grid=(2,),
                in_specs=[pl.BlockSpec((8, 128), lambda i: (0, 0),
                                       pipeline_mode=pl.Buffered(1))],
                out_specs=pl.BlockSpec((8, 128), lambda i: (i, 0)),
            ),
        )
        jax.jit(f).lower(jnp.zeros((8, 128), jnp.float32)).compile()
        return True
    except Exception:
        return False


# ---------------------------------------------------------------------------
# Tiling choice
# ---------------------------------------------------------------------------
def _choose_tm(B, Dp, out_bytes, resident_weight_bytes, vmem_budget):
    """Largest row tile with <=12.5% batch padding waste, >=2 grid steps when the
    batch allows (megacore), and fitting the VMEM budget."""
    B8 = _round_up(max(B, 1), _SUBLANE)
    min_steps = 2 if B8 >= 2 * _SUBLANE else 1
    for cand in (1024, 512, 256, 128, 64, 32, 16, 8):
        if cand > B8:
            continue
        Bp = _round_up(B8, cand)
        if Bp // cand < min_steps:
            continue
        if (Bp - B8) / Bp > 0.125:
            continue
        # double-buffered bf16 x tile + double-buffered out tile + f32 intermediates
        tile_bytes = 2 * cand * Dp * 2 + 2 * cand * Dp * out_bytes + 24 * cand * Dp
        if resident_weight_bytes + tile_bytes > vmem_budget:
            continue
        return cand
    return _SUBLANE


# ---------------------------------------------------------------------------
# pallas_call construction
# ---------------------------------------------------------------------------
def _make_pallas_call(Bp, Dp, tm, out_dtype, single_buffer_weights):
    num_m = Bp // tm
    out_bytes = jnp.dtype(out_dtype).itemsize

    w_kwargs = dict(pipeline_mode=pl.Buffered(1)) if single_buffer_weights else {}
    wa_spec = pl.BlockSpec((Dp, 2 * Dp), lambda i: (0, 0), **w_kwargs)
    w2_spec = pl.BlockSpec((Dp, Dp), lambda i: (0, 0), **w_kwargs)
    ba_spec = pl.BlockSpec((1, 2 * Dp), lambda i: (0, 0))
    b2_spec = pl.BlockSpec((1, Dp), lambda i: (0, 0))
    x_spec = pl.BlockSpec((tm, Dp), lambda i: (i, 0))
    o_spec = pl.BlockSpec((tm, Dp), lambda i: (i, 0))

    weight_bufs = 1 if single_buffer_weights else 2
    wbytes = 3 * Dp * Dp * 2 * weight_bufs
    tile_bytes = 2 * tm * Dp * 2 + 2 * tm * Dp * out_bytes + 24 * tm * Dp
    vmem_limit = min(int(1.25 * (wbytes + tile_bytes)) + (8 << 20), _vmem_budget())
    vmem_limit = max(vmem_limit, 16 << 20)

    cost = pl.CostEstimate(
        flops=6 * Bp * Dp * Dp + 5 * Bp * Dp,
        transcendentals=Bp * Dp,
        bytes_accessed=3 * Dp * Dp * 2 + 3 * Dp * 4 + Bp * Dp * (2 + out_bytes),
    )

    return pl.pallas_call(
        combined_projection_head_kernel,
        out_shape=jax.ShapeDtypeStruct((Bp, Dp), out_dtype),
        grid_spec=pltpu.PrefetchScalarGridSpec(
            num_scalar_prefetch=0,
            grid=(num_m,),
            in_specs=[x_spec, wa_spec, ba_spec, w2_spec, b2_spec],
            out_specs=o_spec,
        ),
        compiler_params=pltpu.CompilerParams(
            dimension_semantics=("parallel",),
            vmem_limit_bytes=vmem_limit,
        ),
        cost_estimate=cost,
    )


# ---------------------------------------------------------------------------
# Public wrapper
# ---------------------------------------------------------------------------
def combined_projection_head(x, kparams, *, out_dtype=None, tm=None):
    """x: (B, D). kparams: output of pack_params(). out_dtype defaults to x.dtype;
    pass jnp.bfloat16 when the consumer accepts it to halve writeback bytes."""
    B, D = x.shape
    assert D == kparams["dim"]
    Dp = kparams["padded_dim"]
    out_dtype = jnp.dtype(out_dtype) if out_dtype is not None else jnp.dtype(x.dtype)
    out_bytes = out_dtype.itemsize

    single_buf = _supports_buffered_pipeline()
    weight_bufs = 1 if single_buf else 2
    resident_weight_bytes = 3 * Dp * Dp * 2 * weight_bufs + 3 * Dp * 4
    budget = _vmem_budget()
    if resident_weight_bytes + 32 * _SUBLANE * Dp > budget:
        # TODO(synk): for very large D, stream weight K/N chunks from HBM via
        # pltpu.emit_pipeline instead of keeping them VMEM-resident.
        raise ValueError(
            f"input_dim={D} too large for the resident-weight kernel: needs "
            f"~{resident_weight_bytes >> 20} MiB VMEM, budget {budget >> 20} MiB")

    if tm is None:
        tm = _choose_tm(B, Dp, out_bytes, resident_weight_bytes, budget)
    else:
        tm = max(_SUBLANE, _round_up(min(tm, _round_up(B, _SUBLANE)), _SUBLANE))

    B8 = _round_up(B, _SUBLANE)
    Bp = _round_up(B8, tm)

    # Pad, then cast x to bf16 once in the wrapper (the kernel truncated it anyway).
    xp = jnp.pad(x, ((0, Bp - B), (0, Dp - D))).astype(jnp.bfloat16)

    out = _make_pallas_call(Bp, Dp, tm, out_dtype, single_buf)(
        xp, kparams["wa"], kparams["ba"], kparams["w2"], kparams["b2"])
    return out[:B, :D]


# ---------------------------------------------------------------------------
# Params
# ---------------------------------------------------------------------------
def init_params(key, input_dim):
    """Mirrors PyTorch nn.Linear default init (U(+-1/sqrt(fan_in))); control_weight=ones.
    Weights stored as (in_dim, out_dim) so forward is x @ W + b."""
    bound = 1.0 / (input_dim ** 0.5)
    ks = jax.random.split(key, 6)
    u = lambda k, shape: jax.random.uniform(k, shape, jnp.float32, -bound, bound)
    return {
        "w1": u(ks[0], (input_dim, input_dim)), "b1": u(ks[1], (input_dim,)),
        "ws": u(ks[2], (input_dim, input_dim)), "bs": u(ks[3], (input_dim,)),
        "cw": jnp.ones((input_dim,), jnp.float32),
        "w2": u(ks[4], (input_dim, input_dim)), "b2": u(ks[5], (input_dim,)),
    }


def pack_params(params):
    """One-time transform (f32 composition, then pad + bf16 cast):
       * fuse fc1/selective_fc:  Wa = [W1 | W1@Ws],  ba = [b1 | b1@Ws + bs]
       * fold control_weight into fc2 rows."""
    D = params["w1"].shape[0]
    Dp = _round_up(D, _LANE)
    w1, ws, w2 = params["w1"], params["ws"], params["w2"]
    b1, bs, b2, cw = params["b1"], params["bs"], params["b2"], params["cw"]

    w1s = w1 @ ws                      # (D, D) f32
    bs_f = b1 @ ws + bs                # (D,)   f32
    w2f = cw[:, None] * w2             # control_weight folded into fc2 rows

    pad2 = lambda w: jnp.pad(w, ((0, Dp - D), (0, Dp - D)))
    pad1 = lambda b: jnp.pad(b, (0, Dp - D))

    wa = jnp.concatenate([pad2(w1), pad2(w1s)], axis=1).astype(jnp.bfloat16)   # (Dp, 2Dp)
    ba = jnp.concatenate([pad1(b1), pad1(bs_f)]).reshape(1, 2 * Dp).astype(jnp.float32)
    return {
        "wa": wa, "ba": ba,
        "w2": pad2(w2f).astype(jnp.bfloat16),
        "b2": pad1(b2).reshape(1, Dp).astype(jnp.float32),
        "dim": D, "padded_dim": Dp,
    }


# ---------------------------------------------------------------------------
# References
# ---------------------------------------------------------------------------
def reference_forward_f32(x, p):
    """Faithful f32 forward of the PyTorch module (sequential, un-fused)."""
    h = x @ p["w1"] + p["b1"]
    s = h @ p["ws"] + p["bs"]
    sel = (s * jax.nn.sigmoid(s)) * h
    adj = sel * p["cw"]
    return adj @ p["w2"] + p["b2"]


def reference_forward_kernel_math(x, p):
    """Same math as the kernel: W1@Ws / b1@Ws+bs composed in f32, bf16 matmul
    operands, f32 accumulation, f32 gating, control_weight folded into fc2."""
    bf = lambda a: a.astype(jnp.bfloat16)
    w1s = p["w1"] @ p["ws"]
    bs_f = p["b1"] @ p["ws"] + p["bs"]
    w2f = p["cw"][:, None] * p["w2"]
    xb = bf(x)
    h = jnp.dot(xb, bf(p["w1"]), preferred_element_type=jnp.float32) + p["b1"]
    s = jnp.dot(xb, bf(w1s), preferred_element_type=jnp.float32) + bs_f
    sel = (s * jax.nn.sigmoid(s)) * h
    return jnp.dot(bf(sel), bf(w2f), preferred_element_type=jnp.float32) + p["b2"]


# ---------------------------------------------------------------------------
if __name__ == "__main__":
    key = jax.random.PRNGKey(0)

    # (8, 32) = spec's toy size; (300, 128) exercises the padding-waste-aware TM
    # choice with an awkward batch; (512, 128) exercises a multi-step pipelined grid.
    for (B, D) in ((8, 32), (300, 128), (512, 128)):
        k_x, k_p, key = jax.random.split(key, 3)
        x = jax.random.normal(k_x, (B, D), dtype=jnp.float32)
        params = init_params(k_p, D)
        kparams = pack_params(params)

        out = jax.block_until_ready(combined_projection_head(x, kparams))
        assert out.shape == (B, D) and out.dtype == jnp.float32

        # Tight check vs a reference applying identical fusion / bf16 casts / f32 accum.
        ref_k = reference_forward_kernel_math(x, params)
        assert jnp.allclose(out, ref_k, atol=2e-3, rtol=2e-3), "mismatch vs kernel-math ref"

        # Loose sanity check vs the full-f32 PyTorch-equivalent forward.
        ref_f32 = reference_forward_f32(x, params)
        assert jnp.allclose(out, ref_f32, atol=5e-2, rtol=5e-2), "mismatch vs f32 reference"

    # Optional bf16-output path (halves writeback bytes when the consumer accepts it).
    k_x, k_p, key = jax.random.split(key, 3)
    x = jax.random.normal(k_x, (8, 32), dtype=jnp.float32)
    params = init_params(k_p, 32)
    kparams = pack_params(params)
    out_bf = jax.block_until_ready(
        combined_projection_head(x, kparams, out_dtype=jnp.bfloat16))
    assert out_bf.dtype == jnp.bfloat16
    assert jnp.allclose(out_bf.astype(jnp.float32), reference_forward_f32(x, params),
                        atol=6e-2, rtol=6e-2), "mismatch on bf16-output path"

    print("KERNEL_OK")
</pallas_src>

<mosaic_0001>
module attributes {stable_mosaic.version = 11 : i64} {
  func.func @combined_projection_head_kernel(%arg0: i32, %arg1: memref<8x128xbf16, #tpu.memory_space<vmem>>, %arg2: memref<128x256xbf16, #tpu.memory_space<vmem>>, %arg3: memref<1x256xf32, #tpu.memory_space<vmem>>, %arg4: memref<128x128xbf16, #tpu.memory_space<vmem>>, %arg5: memref<1x128xf32, #tpu.memory_space<vmem>>, %arg6: memref<8x128xf32, #tpu.memory_space<vmem>>) attributes {dimension_semantics = [#tpu.dimension_semantics<parallel>], iteration_bounds = array<i64: 1>, scalar_prefetch = 0 : i64, scratch_operands = 0 : i64, tpu.core_type = #tpu.core_type<tc>, window_params = [{transform_indices = @transform_0, window_bounds = array<i64: 8, 128>}, {pipeline_mode = #tpu.pipeline_mode<synchronous>, transform_indices = @transform_1, window_bounds = array<i64: 128, 256>}, {pipeline_mode = #tpu.pipeline_mode<synchronous>, transform_indices = @transform_2, window_bounds = array<i64: 1, 256>}, {pipeline_mode = #tpu.pipeline_mode<synchronous>, transform_indices = @transform_3, window_bounds = array<i64: 128, 128>}, {pipeline_mode = #tpu.pipeline_mode<synchronous>, transform_indices = @transform_4, window_bounds = array<i64: 1, 128>}, {transform_indices = @transform_5, window_bounds = array<i64: 8, 128>}]} {
    %c0 = arith.constant 0 : index
    %c0_0 = arith.constant 0 : index
    %0 = vector.load %arg1[%c0, %c0_0] : memref<8x128xbf16, #tpu.memory_space<vmem>>, vector<8x128xbf16>
    %c0_1 = arith.constant 0 : index
    %c0_2 = arith.constant 0 : index
    %1 = vector.load %arg2[%c0_1, %c0_2] : memref<128x256xbf16, #tpu.memory_space<vmem>>, vector<128x256xbf16>
    %cst = arith.constant dense<0.000000e+00> : vector<8x256xf32>
    %2 = tpu.matmul %0, %1, %cst {dimension_numbers = #tpu.dot_dimension_numbers<[1], [0], [0], [1], [0, 0, 1, 1], [], []>} : vector<8x128xbf16>, vector<128x256xbf16>, vector<8x256xf32> -> vector<8x256xf32>
    %c0_3 = arith.constant 0 : index
    %c0_4 = arith.constant 0 : index
    %3 = vector.load %arg3[%c0_3, %c0_4] : memref<1x256xf32, #tpu.memory_space<vmem>>, vector<1x256xf32>
    %4 = vector.broadcast %3 : vector<1x256xf32> to vector<8x256xf32>
    %5 = arith.addf %2, %4 : vector<8x256xf32>
    %6 = vector.extract_strided_slice %5 {offsets = [0, 0], sizes = [8, 128], strides = [1, 1]} : vector<8x256xf32> to vector<8x128xf32>
    %7 = vector.extract_strided_slice %5 {offsets = [0, 128], sizes = [8, 128], strides = [1, 1]} : vector<8x256xf32> to vector<8x128xf32>
    %8 = arith.negf %7 : vector<8x128xf32>
    %9 = math.exp %8 : vector<8x128xf32>
    %cst_5 = arith.constant 1.000000e+00 : f32
    %10 = vector.broadcast %cst_5 : f32 to vector<8x128xf32>
    %11 = arith.addf %10, %9 : vector<8x128xf32>
    %12 = arith.divf %10, %11 : vector<8x128xf32>
    %13 = arith.mulf %7, %12 : vector<8x128xf32>
    %14 = arith.mulf %13, %6 : vector<8x128xf32>
    %15 = arith.truncf %14 : vector<8x128xf32> to vector<8x128xbf16>
    %c0_6 = arith.constant 0 : index
    %c0_7 = arith.constant 0 : index
    %16 = vector.load %arg4[%c0_6, %c0_7] : memref<128x128xbf16, #tpu.memory_space<vmem>>, vector<128x128xbf16>
    %cst_8 = arith.constant dense<0.000000e+00> : vector<8x128xf32>
    %17 = tpu.matmul %15, %16, %cst_8 {dimension_numbers = #tpu.dot_dimension_numbers<[1], [0], [0], [1], [0, 0, 1, 1], [], []>} : vector<8x128xbf16>, vector<128x128xbf16>, vector<8x128xf32> -> vector<8x128xf32>
    %c0_9 = arith.constant 0 : index
    %c0_10 = arith.constant 0 : index
    %18 = vector.load %arg5[%c0_9, %c0_10] : memref<1x128xf32, #tpu.memory_space<vmem>>, vector<1x128xf32>
    %19 = vector.broadcast %18 : vector<1x128xf32> to vector<8x128xf32>
    %20 = arith.addf %17, %19 : vector<8x128xf32>
    %c0_11 = arith.constant 0 : index
    %c0_12 = arith.constant 0 : index
    %21 = vector.load %arg6[%c0_11, %c0_12] : memref<8x128xf32, #tpu.memory_space<vmem>>, vector<8x128xf32>
    tpu.vector_store %arg6[%c0_11, %c0_12], %20 {strides = array<i32>} : memref<8x128xf32, #tpu.memory_space<vmem>>, vector<8x128xf32>,
    return
  }
  func.func @transform_0(%arg0: i32) -> (i32, i32) {
    %c0_i32 = arith.constant 0 : i32
    %c0_i32_0 = arith.constant 0 : i32
    return %arg0, %c0_i32 : i32, i32
  }
  func.func @transform_1(%arg0: i32) -> (i32, i32) {
    %c0_i32 = arith.constant 0 : i32
    %c0_i32_0 = arith.constant 0 : i32
    %c0_i32_1 = arith.constant 0 : i32
    return %c0_i32, %c0_i32_0 : i32, i32
  }
  func.func @transform_2(%arg0: i32) -> (i32, i32) {
    %c0_i32 = arith.constant 0 : i32
    %c0_i32_0 = arith.constant 0 : i32
    %c0_i32_1 = arith.constant 0 : i32
    return %c0_i32, %c0_i32_0 : i32, i32
  }
  func.func @transform_3(%arg0: i32) -> (i32, i32) {
    %c0_i32 = arith.constant 0 : i32
    %c0_i32_0 = arith.constant 0 : i32
    %c0_i32_1 = arith.constant 0 : i32
    return %c0_i32, %c0_i32_0 : i32, i32
  }
  func.func @transform_4(%arg0: i32) -> (i32, i32) {
    %c0_i32 = arith.constant 0 : i32
    %c0_i32_0 = arith.constant 0 : i32
    %c0_i32_1 = arith.constant 0 : i32
    return %c0_i32, %c0_i32_0 : i32, i32
  }
  func.func @transform_5(%arg0: i32) -> (i32, i32) {
    %c0_i32 = arith.constant 0 : i32
    %c0_i32_0 = arith.constant 0 : i32
    return %arg0, %c0_i32 : i32, i32
  }
}

</mosaic_0001>

<bundles_post_ra>
// kernel: tpu_custom_call.1
= control target key start
LH: loop header
LB: loop body
LE: loop exit
PB: predicated region body
PF: predicated region fallthrough
CT: control target
= control target key end

     0   :  { %10 = vsyncpa [#allocation3], 0  ;;  %s639_s0 = inlined_call_operand.hbm [shape: bf16[8,128], index: 0, kind: input, shape index: {}]   ;;  %s640_s1 = inlined_call_operand.hbm [shape: bf16[128,256], index: 1, kind: input, shape index: {}]   ;;  %s641_s2 = inlined_call_operand.vmem [shape: f32[1,256], index: 2, kind: input, shape index: {}]   ;;  %s642_s3 = inlined_call_operand.hbm [shape: bf16[128,128], index: 3, kind: input, shape index: {}]   ;;  %s643_s4 = inlined_call_operand.vmem [shape: f32[1,128], index: 4, kind: input, shape index: {}]   ;;  %s644_s5 = inlined_call_operand.hbm [shape: f32[8,128], index: 5, kind: output, shape index: {}]  }
   0x1   :  { %11 = vsyncpa [#allocation6], 0 }
   0x2   :  { %12 = vsyncpa [#allocation4], 0  ;;  %s544_s18 = smov [#allocation5]   ;;  %s450_s22 = scalar_lea.hbm %s640_s1, 2048 }
   0x3   :  { %s28_s19 = sshll.u32 %s544_s18, 4  ;;  %p451_p0 = scmp.ne.s32.totalorder %s640_s1, %s450_s22  ;;  %s29_s19 = int_to_ptr.vmem [resolvable:$true] %s28_s19 }
   0x4   :  { %p454_p1 = scmp.lt.u32.totalorder %s450_s22, %s640_s1 }
   0x6   :  { %p456_p2 = pnand %p454_p1, %p451_p0 }
   0x8   :  { %459 = shalt.err (!%p456_p2)
}
   0x9   :  { %s460_s27 = scalar_lea.vmem %s29_s19, 2048  ;;  %p465_p4 = scmp.lt.s32.totalorder %s29_s19, %s29_s19 }
   0xa   :  { %p461_p3 = scmp.ne.s32.totalorder %s29_s19, %s460_s27  ;;  %p466_p5 = scmp.lt.s32.totalorder %s460_s27, %s460_s27 }
   0xc   :  { %p467_p6 = por %p466_p5, %p465_p4 }
   0xe   :  { %p468_p7 = pnand %p467_p6, %p461_p3 }
  0x10   :  { %471 = shalt.err (!%p468_p7)
}
  0x11   :  { %s545_s28 = smov 128   ;;  %s546_s29 = smov 8  }
  0x12   :  { %34 = dma.hbm_to_vmem [thread:$0]  %s640_s1, 2048, %s29_s19, [#allocation6], %s545_s28, %s545_s28, %s546_s29  }
  0x13   :  { %s547_s7 = smov [#allocation2]   ;;  %s548_s9 = smov [#allocation7]  }
  0x14   :  { %s19_s8 = sshll.u32 %s547_s7, 4  ;;  %s42_s10 = sshll.u32 %s548_s9, 4  ;;  %s20_s8 = int_to_ptr.vmem [resolvable:$true] %s19_s8  ;;  %s43_s10 = int_to_ptr.vmem [resolvable:$true] %s42_s10 }
  0x15   :  { %s472_s13 = scalar_lea.hbm %s639_s0, 64 }
  0x16   :  { %p473_p8 = scmp.ne.s32.totalorder %s639_s0, %s472_s13  ;;  %p476_p9 = scmp.lt.u32.totalorder %s472_s13, %s639_s0 }
  0x18   :  { %p478_p10 = pnand %p476_p9, %p473_p8 }
  0x1a   :  { %481 = shalt.err (!%p478_p10)
}
  0x1b   :  { %s482_s1 = scalar_lea.vmem %s20_s8, 64  ;;  %p487_p12 = scmp.lt.s32.totalorder %s20_s8, %s20_s8 }
  0x1c   :  { %p483_p11 = scmp.ne.s32.totalorder %s20_s8, %s482_s1  ;;  %p488_p13 = scmp.lt.s32.totalorder %s482_s1, %s482_s1 }
  0x1e   :  { %p489_p0 = por %p488_p13, %p487_p12 }
  0x20   :  { %p490_p1 = pnand %p489_p0, %p483_p11 }
  0x22   :  { %493 = shalt.err (!%p490_p1)
}
  0x23   :  { %22 = dma.hbm_to_vmem [thread:$0]  %s639_s0, 64, %s20_s8, [#allocation3]  }
  0x24   :  { %s494_s22 = scalar_lea.hbm %s642_s3, 1024 }
  0x25   :  { %p495_p2 = scmp.ne.s32.totalorder %s642_s3, %s494_s22  ;;  %p498_p3 = scmp.lt.u32.totalorder %s494_s22, %s642_s3 }
  0x27   :  { %p500_p4 = pnand %p498_p3, %p495_p2 }
  0x29   :  { %503 = shalt.err (!%p500_p4)
}
  0x2a   :  { %s504_s27 = scalar_lea.vmem %s43_s10, 1024  ;;  %p509_p6 = scmp.lt.s32.totalorder %s43_s10, %s43_s10 }
  0x2b   :  { %p505_p5 = scmp.ne.s32.totalorder %s43_s10, %s504_s27  ;;  %p510_p7 = scmp.lt.s32.totalorder %s504_s27, %s504_s27 }
  0x2d   :  { %p511_p8 = por %p510_p7, %p509_p6 }
  0x2f   :  { %p512_p9 = pnand %p511_p8, %p505_p5 }
  0x31   :  { %515 = shalt.err (!%p512_p9)
}
  0x32   :  { %s549_s0 = smov 64   ;;  %s550_s28 = smov 4  }
  0x33   :  { %48 = dma.hbm_to_vmem [thread:$0]  %s642_s3, 1024, %s43_s10, [#allocation6], %s549_s0, %s549_s0, %s550_s28  }
  0x34   :  { %538 = dma.done.wait [#allocation3], 64  }
  0x35   :  { %539 = vsyncadd [#allocation3], 4294967232 }
  0x36   :  { %540 = dma.done.wait [#allocation6], 3072  }
  0x37   :  { %541 = vsyncadd [#allocation6], 4294964224  ;;  %v551_v0 = vmov 0   ;;  %v414_v1 = vld [vmem:[#allocation5 + $0x4] ss:$8 sps:$4 sm:$0xff]   ;;  %v552_v19 = vmov 0.0   ;;  %v80_v27 = vlaneseq }
  0x38   :  { %202 = vmatprep.mubr.bf16.mxu0 %v551_v0  ;;  %v416_v2 = vld [vmem:[#allocation5] ss:$8 sps:$4 sm:$0xff]   ;;  %170 = vmatprep.subr.bf16.mxu0 %v414_v1  ;;  %v417_v3 = vld [vmem:[#allocation5 + $0x14] ss:$8 sps:$4 sm:$0xff]   ;;  %v419_v4 = vld [vmem:[#allocation5 + $0x10] ss:$8 sps:$4 sm:$0xff]  }
  0x39   :  { %171 = vmatpush1.bf16.msra.mxu0 %v416_v2  ;;  %v420_v5 = vld [vmem:[#allocation5 + $0x24] ss:$8 sps:$4 sm:$0xff]   ;;  %v422_v6 = vld [vmem:[#allocation5 + $0x20] ss:$8 sps:$4 sm:$0xff]   ;;  %v423_v7 = vld [vmem:[#allocation5 + $0x34] ss:$8 sps:$4 sm:$0xff]   ;;  %383 = vmatprep.subr.bf16.mxu1 %v552_v19 }
  0x3a   :  { %172 = vmatprep.subr.bf16.mxu0 %v417_v3  ;;  %v425_v8 = vld [vmem:[#allocation5 + $0x30] ss:$8 sps:$4 sm:$0xff]   ;;  %v426_v9 = vld [vmem:[#allocation5 + $0x44] ss:$8 sps:$4 sm:$0xff]   ;;  %v428_v10 = vld [vmem:[#allocation5 + $0x40] ss:$8 sps:$4 sm:$0xff]  }
  0x3b   :  { %v429_v11 = vld [vmem:[#allocation5 + $0x54] ss:$8 sps:$4 sm:$0xff]   ;;  %v431_v12 = vld [vmem:[#allocation5 + $0x50] ss:$8 sps:$4 sm:$0xff]   ;;  %v432_v13 = vld [vmem:[#allocation5 + $0x64] ss:$8 sps:$4 sm:$0xff]  }
  0x3c   :  { %v434_v14 = vld [vmem:[#allocation5 + $0x60] ss:$8 sps:$4 sm:$0xff]   ;;  %v435_v15 = vld [vmem:[#allocation5 + $0x74] ss:$8 sps:$4 sm:$0xff]   ;;  %v437_v16 = vld [vmem:[#allocation5 + $0x70] ss:$8 sps:$4 sm:$0xff]  }
  0x3d   :  { %173 = vmatpush1.bf16.msra.mxu0 %v419_v4  ;;  %v61_v17 = vld [vmem:[#allocation2] sm:$0xf]  ;;  %v438_v18 = vld [vmem:[#allocation7] sm:$0xff]   ;;  %v439_v20 = vld [vmem:[#allocation7 + $0x8] sm:$0xff]   ;;  %vm553_vm0 = vmmov 0   ;;  %v81_v28 = vshrl.u32 %v80_v27, 7 }
  0x3e   :  { %174 = vmatprep.subr.bf16.mxu0 %v420_v5  ;;  %384 = vmatpush3.bf16.msra.mxu1 %v438_v18  ;;  %v440_v21 = vld [vmem:[#allocation7 + $0x10] sm:$0xff]   ;;  %v441_v22 = vld [vmem:[#allocation7 + $0x18] sm:$0xff]   ;;  %v442_v23 = vld [vmem:[#allocation7 + $0x20] sm:$0xff]   ;;  %s554_s8 = smov [#allocation8]  }
  0x3f   :  { %385 = vmatprep.subr.bf16.mxu1 %v552_v19  ;;  %v443_v24 = vld [vmem:[#allocation7 + $0x28] sm:$0xff]   ;;  %v444_v25 = vld [vmem:[#allocation7 + $0x30] sm:$0xff]   ;;  %v445_v26 = vld [vmem:[#allocation7 + $0x38] sm:$0xff]   ;;  %399 = vmatprep.mubr.msk.bf16.mxu1 %vm553_vm0, %v552_v19  ;;  %v86_v29 = vsub.s32 1, %v81_v28  ;;  %v82_v40 = vsub.s32 0, %v81_v28  ;;  %s338_s9 = sshll.u32 %s554_s8, 4  ;;  %s339_s9 = int_to_ptr.vmem [resolvable:$true] %s338_s9 }
  0x40   :  { %v78_v30 = vld [vmem:[%s641_s2] sm:$0x3]  ;;  %s516_s10 = scalar_lea.vmem %s339_s9, 128  ;;  %p521_p11 = scmp.lt.s32.totalorder %s339_s9, %s339_s9 }
  0x41   :  { %175 = vmatpush1.bf16.msra.mxu0 %v422_v6  ;;  %v87_v31 = vrot.slane %v78_v30, %v86_v29  ;;  %v83_v41 = vrot.slane %v78_v30, %v82_v40  ;;  %v365_v47 = vld [vmem:[%s643_s4] ss:$0 sm:$0xff]  ;;  %p517_p10 = scmp.ne.s32.totalorder %s339_s9, %s516_s10  ;;  %p522_p12 = scmp.lt.s32.totalorder %s516_s10, %s516_s10 }
  0x42   :  { %176 = vmatprep.subr.bf16.mxu0 %v423_v7  ;;  %386 = vmatpush3.bf16.msra.mxu1 %v439_v20 }
  0x43   :  { %387 = vmatprep.subr.bf16.mxu1 %v552_v19  ;;  %p523_p13 = por %p522_p12, %p521_p11 }
  0x45   :  { %177 = vmatpush1.bf16.msra.mxu0 %v425_v8  ;;  %p524_p0 = pnand %p523_p13, %p517_p10 }
  0x46   :  { %178 = vmatprep.subr.bf16.mxu0 %v426_v9  ;;  %388 = vmatpush3.bf16.msra.mxu1 %v440_v21 }
  0x47   :  { %389 = vmatprep.subr.bf16.mxu1 %v552_v19 }
  0x49   :  { %179 = vmatpush1.bf16.msra.mxu0 %v428_v10 }
  0x4a   :  { %180 = vmatprep.subr.bf16.mxu0 %v429_v11  ;;  %390 = vmatpush3.bf16.msra.mxu1 %v441_v22 }
  0x4b   :  { %391 = vmatprep.subr.bf16.mxu1 %v552_v19 }
  0x4d   :  { %181 = vmatpush1.bf16.msra.mxu0 %v431_v12 }
  0x4e   :  { %182 = vmatprep.subr.bf16.mxu0 %v432_v13  ;;  %392 = vmatpush3.bf16.msra.mxu1 %v442_v23 }
  0x4f   :  { %393 = vmatprep.subr.bf16.mxu1 %v552_v19 }
  0x51   :  { %183 = vmatpush1.bf16.msra.mxu0 %v434_v14 }
  0x52   :  { %184 = vmatprep.subr.bf16.mxu0 %v435_v15  ;;  %394 = vmatpush3.bf16.msra.mxu1 %v443_v24 }
  0x53   :  { %395 = vmatprep.subr.bf16.mxu1 %v552_v19 }
  0x55   :  { %185 = vmatpush1.bf16.msra.mxu0 %v437_v16 }
  0x56   :  { %396 = vmatpush3.bf16.msra.mxu1 %v444_v25 }
  0x57   :  { %397 = vmatprep.subr.bf16.mxu1 %v552_v19 }
  0x58   :  { %203 = vmatmul.mubr.bf16.vlgmr.msra.gmra.mrb[0].mxu0 %v61_v17 }
  0x5a   :  { %398 = vmatpush3.bf16.msra.mxu1 %v445_v26 }
 0x12b   :  { %v204_v32 = vpop.f32.mrb[0].mxu0 }
 0x12c   :  { %v206_v33 = vpop.f32.mrb[1].mxu0  ;;  %v205_v43 = vadd.f32 %v204_v32, %v83_v41 }
 0x12d   :  { %v207_v34 = vadd.f32 %v206_v33, %v87_v31  ;;  %v208_v35 = vpop.f32.mrb[2].mxu0 }
 0x12e   :  { %v209_v36 = vpop.f32.mrb[3].mxu0 }
 0x12f   :  { %v364_v37 = vmul.f32 -1.442695, %v207_v34 }
 0x131   :  { %446 = vpow2.f32 %v364_v37 }
 0x13b   :  { %v447_v38 = vpop.eup %446 }
 0x13c   :  { %v214_v39 = vadd.f32 1.0, %v447_v38 }
 0x13e   :  { %448 = vrcp.f32 %v214_v39 }
 0x148   :  { %v449_v42 = vpop.eup %448 }
 0x149   :  { %v217_v44 = vmul.f32 %v449_v42, %v207_v34 }
 0x14b   :  { %v218_v45 = vmul.f32 %v217_v44, %v205_v43 }
 0x14d   :  { %v219_v46 = vpack.c.bf16 %v218_v45, %v218_v45 }
 0x14f   :  { %400 = vmatmul.mubr.bf16.vlgmr.msra.gmra.mrb[0].mxu1 %v219_v46 }
 0x222   :  { %v325_v48 = vpop.f32.mrb[0].mxu1 }
 0x223   :  { %v326_v49 = vadd.f32 %v365_v47, %v325_v48  ;;  %v401_v50 = vpop.f32.mrb[1].mxu1 }
 0x224   :  { %v328_v51 = vpop.f32.mrb[2].mxu1 }
 0x225   :  { %331 = vst [vmem:[#allocation8] sm:$0xff] %v326_v49  ;;  %v402_v52 = vpop.f32.mrb[3].mxu1 }
 0x226   :  { %527 = shalt.err (!%p524_p0)
}
 0x227   :  { %s528_s4 = scalar_lea.hbm %s644_s5, 128 }
 0x228   :  { %p529_p1 = scmp.ne.s32.totalorder %s644_s5, %s528_s4  ;;  %p532_p2 = scmp.lt.u32.totalorder %s528_s4, %s644_s5 }
 0x22a   :  { %p534_p3 = pnand %p532_p2, %p529_p1 }
 0x22c   :  { %537 = shalt.err (!%p534_p3)
}
 0x22d   :  { %341 = dma.vmem_to_hbm [thread:$0]  %s339_s9, 128, %s644_s5, [#allocation4]  }
 0x22e   :  { %542 = dma.done.wait [#allocation4], 128  }
 0x22f   :  { %543 = vsyncadd [#allocation4], 4294967168 }
 0x230   :  { %345 = vsyncpa [#allocation3], 1 }
 0x231   :  { %346 = vsyncpa [#allocation6], 1 }
 0x232   :  { %347 = vsyncpa [#allocation4], 1 }

</bundles_post_ra>
